<compile_context>
chip_gen: v7x
topology: tpu7x:2x2x1
jax: 0.10.0
libtpu: 0.0.40
codegen_flags: <defaults>
</compile_context>

<pallas_src>
import functools

import jax
import jax.numpy as jnp
from jax.experimental import pallas as pl
from jax.experimental.pallas import tpu as pltpu


def _round_up(n, m):
    return ((n + m - 1) // m) * m


def _softplus(y):
    # Matches torch.nn.functional.softplus(beta=1, threshold=20):
    # y where y > 20, else log(1 + exp(y)).  No clamp needed: the overflowed exp()
    # branch (inf) is discarded by the where().
    return jnp.where(y > 20.0, y, jnp.log1p(jnp.exp(y)))


def _estimate_mu_kernel(x_ref, w1_ref, b1_ref, w2_ref, b2_ref,
                        w3_ref, b3_ref, w4_ref, b4_ref, o_ref, *, mc):
    bf16 = jnp.bfloat16
    n_chunks = x_ref.shape[0] // mc

    # Run the full 4-layer chain per `mc`-row batch chunk (static unroll) so the
    # elementwise epilogue of one chunk overlaps the MXU work of the next.
    for c in range(n_chunks):
        rows = pl.ds(c * mc, mc)
        xc = x_ref[rows, :]                                              # bf16 (mc, K)

        # Layer 1: [mc, K] @ [K, 1024]  (bf16 MXU inputs, f32 accumulate)
        h1 = jnp.dot(xc, w1_ref[...], preferred_element_type=jnp.float32) + b1_ref[...]
        h1 = jnp.maximum(h1, 0.0)

        # Layer 2: [mc, 1024] @ [1024, 256]
        h2 = jnp.dot(h1.astype(bf16), w2_ref[...],
                     preferred_element_type=jnp.float32) + b2_ref[...]
        h2 = jnp.maximum(h2, 0.0)

        # Dropout(0.5) is identity in eval/inference mode.
        # TODO(synk): training-mode dropout (pltpu.prng_random_bits mask + 2x rescale) not emitted.

        # Layer 3: [mc, 256] @ [256, 128]   (64 padded to 128; padded cols stay 0 through ReLU)
        h3 = jnp.dot(h2.astype(bf16), w3_ref[...],
                     preferred_element_type=jnp.float32) + b3_ref[...]
        h3 = jnp.maximum(h3, 0.0)

        # Layer 4: [mc, 128] @ [128, 128]   (out_dim padded to 128 -> lane-dense store)
        y = jnp.dot(h3.astype(bf16), w4_ref[...],
                    preferred_element_type=jnp.float32) + b4_ref[...]
        o_ref[rows, :] = _softplus(y)


def estimate_mu_forward(x, params, tb_max=1024):
    """x: [B, input_dim] float32. params: dict of w1..w4 ([in,out]) and b1..b4 ([out])."""
    B, in_dim = x.shape
    out_dim = params["w4"].shape[1]

    K  = in_dim                                   # contraction dim left unpadded (full-dim block)
    H1 = params["w1"].shape[1]                    # 1024
    H2 = params["w2"].shape[1]                    # 256
    H3 = _round_up(params["w3"].shape[1], 128)    # 64  -> 128 (lane-dense)
    O  = _round_up(out_dim, 128)                  # 4   -> 128 (lane-dense store)

    def pad2(a, r, c):
        return jnp.pad(a, ((0, r - a.shape[0]), (0, c - a.shape[1])))

    # Weights pre-cast to bf16 (halves weight DMA bytes), biases stay f32.
    w1 = params["w1"].astype(jnp.bfloat16)
    w2 = params["w2"].astype(jnp.bfloat16)
    w3 = pad2(params["w3"], H2, H3).astype(jnp.bfloat16)
    w4 = pad2(params["w4"], H3, O).astype(jnp.bfloat16)
    b1 = params["b1"].reshape(1, -1).astype(jnp.float32)
    b2 = params["b2"].reshape(1, -1).astype(jnp.float32)
    b3 = pad2(params["b3"].reshape(1, -1), 1, H3).astype(jnp.float32)
    b4 = pad2(params["b4"].reshape(1, -1), 1, O).astype(jnp.float32)

    # ---- batch tiling --------------------------------------------------------
    B8 = _round_up(B, 8)
    if B8 <= 128:
        tb, Bp = B8, B8                               # tiny batch: single small tile
    else:
        # >=2 grid steps (feeds both v7x TensorCores); tiles a multiple of 64, up to tb_max.
        tb = min(tb_max, _round_up(pl.cdiv(B8, 2), 64))
        Bp = _round_up(B8, tb)

    # Intra-kernel batch chunk (full layer chain per chunk); must divide tb.
    if tb % 128 == 0:
        mc = 128
    elif tb % 64 == 0:
        mc = 64
    else:
        mc = tb

    # bf16 input, batch rows padded to the tile grid; contraction dim NOT padded.
    xp = jnp.pad(x.astype(jnp.bfloat16), ((0, Bp - B), (0, 0)))

    grid = (Bp // tb,)

    def resident(a):  # whole array resident; constant block index => single DMA, no re-fetch
        return pl.BlockSpec(a.shape, lambda i: (0, 0))

    in_specs = [
        pl.BlockSpec((tb, K), lambda i: (i, 0)),      # x: tiled along batch
        resident(w1), resident(b1),
        resident(w2), resident(b2),
        resident(w3), resident(b3),
        resident(w4), resident(b4),
    ]
    out_specs = pl.BlockSpec((tb, O), lambda i: (i, 0))

    flops = 2 * Bp * (K * H1 + H1 * H2 + H2 * H3 + H3 * O)
    bytes_accessed = (xp.size * 2 + Bp * O * 4
                      + (w1.size + w2.size + w3.size + w4.size) * 2
                      + (b1.size + b2.size + b3.size + b4.size) * 4)
    cost = pl.CostEstimate(flops=int(flops),
                           transcendentals=int(2 * Bp * O),
                           bytes_accessed=int(bytes_accessed))

    out = pl.pallas_call(
        functools.partial(_estimate_mu_kernel, mc=mc),
        out_shape=jax.ShapeDtypeStruct((Bp, O), jnp.float32),
        grid=grid,
        in_specs=in_specs,
        out_specs=out_specs,
        compiler_params=pltpu.CompilerParams(
            dimension_semantics=("parallel",)),
        cost_estimate=cost,
    )(xp, w1, b1, w2, b2, w3, b3, w4, b4)

    return out[:B, :out_dim]


def init_params(key, input_dim, output_dim):
    dims = [(input_dim, 1024), (1024, 256), (256, 64), (64, output_dim)]
    params = {}
    for i, (fan_in, fan_out) in enumerate(dims, start=1):
        key, kw, kb = jax.random.split(key, 3)
        bound = 1.0 / jnp.sqrt(fan_in)
        params[f"w{i}"] = jax.random.uniform(
            kw, (fan_in, fan_out), jnp.float32, -bound, bound)
        params[f"b{i}"] = jax.random.uniform(
            kb, (fan_out,), jnp.float32, -bound, bound)
    return params


def reference_forward(x, p):
    # Pure f32 reference (matches the PyTorch module in eval mode).
    h = jnp.maximum(x @ p["w1"] + p["b1"], 0.0)
    h = jnp.maximum(h @ p["w2"] + p["b2"], 0.0)
    h = jnp.maximum(h @ p["w3"] + p["b3"], 0.0)
    y = h @ p["w4"] + p["b4"]
    return _softplus(y)


def reference_forward_bf16(x, p):
    # Reference with the same bf16-input / f32-accumulate matmul policy as the kernel.
    bf = jnp.bfloat16
    h = jnp.maximum(jnp.dot(x.astype(bf), p["w1"].astype(bf),
                            preferred_element_type=jnp.float32) + p["b1"], 0.0)
    h = jnp.maximum(jnp.dot(h.astype(bf), p["w2"].astype(bf),
                            preferred_element_type=jnp.float32) + p["b2"], 0.0)
    h = jnp.maximum(jnp.dot(h.astype(bf), p["w3"].astype(bf),
                            preferred_element_type=jnp.float32) + p["b3"], 0.0)
    y = jnp.dot(h.astype(bf), p["w4"].astype(bf),
                preferred_element_type=jnp.float32) + p["b4"]
    return _softplus(y)


if __name__ == "__main__":
    key = jax.random.PRNGKey(0)
    key, kx = jax.random.split(key)

    batch, input_dim, output_dim = 8, 32, 4
    x = jax.random.normal(kx, (batch, input_dim), jnp.float32)
    params = init_params(key, input_dim, output_dim)

    out = jax.block_until_ready(estimate_mu_forward(x, params))
    assert out.shape == (batch, output_dim)

    ref_bf16 = reference_forward_bf16(x, params)
    ref_f32 = reference_forward(x, params)
    assert jnp.allclose(out, ref_bf16, atol=1e-3, rtol=1e-3), \
        f"max|diff| vs bf16 ref = {jnp.max(jnp.abs(out - ref_bf16))}"
    assert jnp.allclose(out, ref_f32, atol=5e-2, rtol=5e-2), \
        f"max|diff| vs f32 ref = {jnp.max(jnp.abs(out - ref_f32))}"

    # Exercise the multi-tile grid + intra-kernel chunking path
    # (B=300 -> tb=192, Bp=384, grid=(2,), 3 chunks of 64 rows per step).
    key, kx2 = jax.random.split(key)
    x2 = jax.random.normal(kx2, (300, input_dim), jnp.float32)
    out2 = jax.block_until_ready(estimate_mu_forward(x2, params))
    assert out2.shape == (300, output_dim)
    assert jnp.allclose(out2, reference_forward_bf16(x2, params), atol=1e-3, rtol=1e-3)

    print("KERNEL_OK")
</pallas_src>

<mosaic_0001>
module attributes {stable_mosaic.version = 11 : i64} {
  func.func @_estimate_mu_kernel(%arg0: i32, %arg1: memref<8x32xbf16, #tpu.memory_space<vmem>>, %arg2: memref<32x1024xbf16, #tpu.memory_space<vmem>>, %arg3: memref<1x1024xf32, #tpu.memory_space<vmem>>, %arg4: memref<1024x256xbf16, #tpu.memory_space<vmem>>, %arg5: memref<1x256xf32, #tpu.memory_space<vmem>>, %arg6: memref<256x128xbf16, #tpu.memory_space<vmem>>, %arg7: memref<1x128xf32, #tpu.memory_space<vmem>>, %arg8: memref<128x128xbf16, #tpu.memory_space<vmem>>, %arg9: memref<1x128xf32, #tpu.memory_space<vmem>>, %arg10: memref<8x128xf32, #tpu.memory_space<vmem>>) attributes {dimension_semantics = [#tpu.dimension_semantics<parallel>], iteration_bounds = array<i64: 1>, scalar_prefetch = 0 : i64, scratch_operands = 0 : i64, tpu.core_type = #tpu.core_type<tc>, window_params = [{transform_indices = @transform_0, window_bounds = array<i64: 8, 32>}, {pipeline_mode = #tpu.pipeline_mode<synchronous>, transform_indices = @transform_1, window_bounds = array<i64: 32, 1024>}, {pipeline_mode = #tpu.pipeline_mode<synchronous>, transform_indices = @transform_2, window_bounds = array<i64: 1, 1024>}, {pipeline_mode = #tpu.pipeline_mode<synchronous>, transform_indices = @transform_3, window_bounds = array<i64: 1024, 256>}, {pipeline_mode = #tpu.pipeline_mode<synchronous>, transform_indices = @transform_4, window_bounds = array<i64: 1, 256>}, {pipeline_mode = #tpu.pipeline_mode<synchronous>, transform_indices = @transform_5, window_bounds = array<i64: 256, 128>}, {pipeline_mode = #tpu.pipeline_mode<synchronous>, transform_indices = @transform_6, window_bounds = array<i64: 1, 128>}, {pipeline_mode = #tpu.pipeline_mode<synchronous>, transform_indices = @transform_7, window_bounds = array<i64: 128, 128>}, {pipeline_mode = #tpu.pipeline_mode<synchronous>, transform_indices = @transform_8, window_bounds = array<i64: 1, 128>}, {transform_indices = @transform_9, window_bounds = array<i64: 8, 128>}]} {
    %c0 = arith.constant 0 : index
    %c0_0 = arith.constant 0 : index
    %0 = vector.load %arg1[%c0, %c0_0] : memref<8x32xbf16, #tpu.memory_space<vmem>>, vector<8x32xbf16>
    %c0_1 = arith.constant 0 : index
    %c0_2 = arith.constant 0 : index
    %1 = vector.load %arg2[%c0_1, %c0_2] : memref<32x1024xbf16, #tpu.memory_space<vmem>>, vector<32x1024xbf16>
    %cst = arith.constant dense<0.000000e+00> : vector<8x1024xf32>
    %2 = tpu.matmul %0, %1, %cst {dimension_numbers = #tpu.dot_dimension_numbers<[1], [0], [0], [1], [0, 0, 1, 1], [], []>} : vector<8x32xbf16>, vector<32x1024xbf16>, vector<8x1024xf32> -> vector<8x1024xf32>
    %c0_3 = arith.constant 0 : index
    %c0_4 = arith.constant 0 : index
    %3 = vector.load %arg3[%c0_3, %c0_4] : memref<1x1024xf32, #tpu.memory_space<vmem>>, vector<1x1024xf32>
    %4 = vector.broadcast %3 : vector<1x1024xf32> to vector<8x1024xf32>
    %5 = arith.addf %2, %4 : vector<8x1024xf32>
    %cst_5 = arith.constant 0.000000e+00 : f32
    %6 = vector.broadcast %cst_5 : f32 to vector<8x1024xf32>
    %7 = arith.maximumf %5, %6 : vector<8x1024xf32>
    %8 = arith.truncf %7 : vector<8x1024xf32> to vector<8x1024xbf16>
    %c0_6 = arith.constant 0 : index
    %c0_7 = arith.constant 0 : index
    %9 = vector.load %arg4[%c0_6, %c0_7] : memref<1024x256xbf16, #tpu.memory_space<vmem>>, vector<1024x256xbf16>
    %cst_8 = arith.constant dense<0.000000e+00> : vector<8x256xf32>
    %10 = tpu.matmul %8, %9, %cst_8 {dimension_numbers = #tpu.dot_dimension_numbers<[1], [0], [0], [1], [0, 0, 1, 1], [], []>} : vector<8x1024xbf16>, vector<1024x256xbf16>, vector<8x256xf32> -> vector<8x256xf32>
    %c0_9 = arith.constant 0 : index
    %c0_10 = arith.constant 0 : index
    %11 = vector.load %arg5[%c0_9, %c0_10] : memref<1x256xf32, #tpu.memory_space<vmem>>, vector<1x256xf32>
    %12 = vector.broadcast %11 : vector<1x256xf32> to vector<8x256xf32>
    %13 = arith.addf %10, %12 : vector<8x256xf32>
    %cst_11 = arith.constant 0.000000e+00 : f32
    %14 = vector.broadcast %cst_11 : f32 to vector<8x256xf32>
    %15 = arith.maximumf %13, %14 : vector<8x256xf32>
    %16 = arith.truncf %15 : vector<8x256xf32> to vector<8x256xbf16>
    %c0_12 = arith.constant 0 : index
    %c0_13 = arith.constant 0 : index
    %17 = vector.load %arg6[%c0_12, %c0_13] : memref<256x128xbf16, #tpu.memory_space<vmem>>, vector<256x128xbf16>
    %cst_14 = arith.constant dense<0.000000e+00> : vector<8x128xf32>
    %18 = tpu.matmul %16, %17, %cst_14 {dimension_numbers = #tpu.dot_dimension_numbers<[1], [0], [0], [1], [0, 0, 1, 1], [], []>} : vector<8x256xbf16>, vector<256x128xbf16>, vector<8x128xf32> -> vector<8x128xf32>
    %c0_15 = arith.constant 0 : index
    %c0_16 = arith.constant 0 : index
    %19 = vector.load %arg7[%c0_15, %c0_16] : memref<1x128xf32, #tpu.memory_space<vmem>>, vector<1x128xf32>
    %20 = vector.broadcast %19 : vector<1x128xf32> to vector<8x128xf32>
    %21 = arith.addf %18, %20 : vector<8x128xf32>
    %cst_17 = arith.constant 0.000000e+00 : f32
    %22 = vector.broadcast %cst_17 : f32 to vector<8x128xf32>
    %23 = arith.maximumf %21, %22 : vector<8x128xf32>
    %24 = arith.truncf %23 : vector<8x128xf32> to vector<8x128xbf16>
    %c0_18 = arith.constant 0 : index
    %c0_19 = arith.constant 0 : index
    %25 = vector.load %arg8[%c0_18, %c0_19] : memref<128x128xbf16, #tpu.memory_space<vmem>>, vector<128x128xbf16>
    %cst_20 = arith.constant dense<0.000000e+00> : vector<8x128xf32>
    %26 = tpu.matmul %24, %25, %cst_20 {dimension_numbers = #tpu.dot_dimension_numbers<[1], [0], [0], [1], [0, 0, 1, 1], [], []>} : vector<8x128xbf16>, vector<128x128xbf16>, vector<8x128xf32> -> vector<8x128xf32>
    %c0_21 = arith.constant 0 : index
    %c0_22 = arith.constant 0 : index
    %27 = vector.load %arg9[%c0_21, %c0_22] : memref<1x128xf32, #tpu.memory_space<vmem>>, vector<1x128xf32>
    %28 = vector.broadcast %27 : vector<1x128xf32> to vector<8x128xf32>
    %29 = arith.addf %26, %28 : vector<8x128xf32>
    %cst_23 = arith.constant 2.000000e+01 : f32
    %30 = vector.broadcast %cst_23 : f32 to vector<8x128xf32>
    %31 = arith.cmpf ogt, %29, %30 : vector<8x128xf32>
    %32 = math.exp %29 : vector<8x128xf32>
    %33 = math.log1p %32 : vector<8x128xf32>
    %34 = arith.select %31, %29, %33 : vector<8x128xi1>, vector<8x128xf32>
    %c0_24 = arith.constant 0 : index
    %c0_25 = arith.constant 0 : index
    %35 = vector.load %arg10[%c0_24, %c0_25] : memref<8x128xf32, #tpu.memory_space<vmem>>, vector<8x128xf32>
    tpu.vector_store %arg10[%c0_24, %c0_25], %34 {strides = array<i32>} : memref<8x128xf32, #tpu.memory_space<vmem>>, vector<8x128xf32>,
    return
  }
  func.func @transform_0(%arg0: i32) -> (i32, i32) {
    %c0_i32 = arith.constant 0 : i32
    %c0_i32_0 = arith.constant 0 : i32
    return %arg0, %c0_i32 : i32, i32
  }
  func.func @transform_1(%arg0: i32) -> (i32, i32) {
    %c0_i32 = arith.constant 0 : i32
    %c0_i32_0 = arith.constant 0 : i32
    %c0_i32_1 = arith.constant 0 : i32
    return %c0_i32, %c0_i32_0 : i32, i32
  }
  func.func @transform_2(%arg0: i32) -> (i32, i32) {
    %c0_i32 = arith.constant 0 : i32
    %c0_i32_0 = arith.constant 0 : i32
    %c0_i32_1 = arith.constant 0 : i32
    return %c0_i32, %c0_i32_0 : i32, i32
  }
  func.func @transform_3(%arg0: i32) -> (i32, i32) {
    %c0_i32 = arith.constant 0 : i32
    %c0_i32_0 = arith.constant 0 : i32
    %c0_i32_1 = arith.constant 0 : i32
    return %c0_i32, %c0_i32_0 : i32, i32
  }
  func.func @transform_4(%arg0: i32) -> (i32, i32) {
    %c0_i32 = arith.constant 0 : i32
    %c0_i32_0 = arith.constant 0 : i32
    %c0_i32_1 = arith.constant 0 : i32
    return %c0_i32, %c0_i32_0 : i32, i32
  }
  func.func @transform_5(%arg0: i32) -> (i32, i32) {
    %c0_i32 = arith.constant 0 : i32
    %c0_i32_0 = arith.constant 0 : i32
    %c0_i32_1 = arith.constant 0 : i32
    return %c0_i32, %c0_i32_0 : i32, i32
  }
  func.func @transform_6(%arg0: i32) -> (i32, i32) {
    %c0_i32 = arith.constant 0 : i32
    %c0_i32_0 = arith.constant 0 : i32
    %c0_i32_1 = arith.constant 0 : i32
    return %c0_i32, %c0_i32_0 : i32, i32
  }
  func.func @transform_7(%arg0: i32) -> (i32, i32) {
    %c0_i32 = arith.constant 0 : i32
    %c0_i32_0 = arith.constant 0 : i32
    %c0_i32_1 = arith.constant 0 : i32
    return %c0_i32, %c0_i32_0 : i32, i32
  }
  func.func @transform_8(%arg0: i32) -> (i32, i32) {
    %c0_i32 = arith.constant 0 : i32
    %c0_i32_0 = arith.constant 0 : i32
    %c0_i32_1 = arith.constant 0 : i32
    return %c0_i32, %c0_i32_0 : i32, i32
  }
  func.func @transform_9(%arg0: i32) -> (i32, i32) {
    %c0_i32 = arith.constant 0 : i32
    %c0_i32_0 = arith.constant 0 : i32
    return %arg0, %c0_i32 : i32, i32
  }
}

</mosaic_0001>

<bundles_post_ra>
// kernel: tpu_custom_call.1
= control target key start
LH: loop header
LB: loop body
LE: loop exit
PB: predicated region body
PF: predicated region fallthrough
CT: control target
= control target key end

     0   :  { %14 = vsyncpa [#allocation3], 0  ;;  %s2547_s0 = inlined_call_operand.hbm [shape: bf16[8,32], index: 0, kind: input, shape index: {}]   ;;  %s2548_s1 = inlined_call_operand.hbm [shape: bf16[32,1024], index: 1, kind: input, shape index: {}]   ;;  %s2549_s2 = inlined_call_operand.hbm [shape: f32[1,1024], index: 2, kind: input, shape index: {}]   ;;  %s2550_s3 = inlined_call_operand.hbm [shape: bf16[1024,256], index: 3, kind: input, shape index: {}]   ;;  %s2551_s4 = inlined_call_operand.vmem [shape: f32[1,256], index: 4, kind: input, shape index: {}]   ;;  %s2552_s5 = inlined_call_operand.hbm [shape: bf16[256,128], index: 5, kind: input, shape index: {}]   ;;  %s2553_s6 = inlined_call_operand.vmem [shape: f32[1,128], index: 6, kind: input, shape index: {}]   ;;  %s2554_s7 = inlined_call_operand.hbm [shape: bf16[128,128], index: 7, kind: input, shape index: {}]   ;;  %s2555_s8 = inlined_call_operand.vmem [shape: f32[1,128], index: 8, kind: input, shape index: {}]   ;;  %s2556_s9 = inlined_call_operand.hbm [shape: f32[8,128], index: 9, kind: output, shape index: {}]  }
   0x1   :  { %15 = vsyncpa [#allocation6], 0 }
   0x2   :  { %16 = vsyncpa [#allocation9], 0 }
   0x3   :  { %17 = vsyncpa [#allocation12], 0 }
   0x4   :  { %18 = vsyncpa [#allocation4], 0  ;;  %s2340_s30 = smov [#allocation5]   ;;  %s2176_s13 = scalar_lea.hbm %s2548_s1, 2048 }
   0x5   :  { %s34_s10 = sshll.u32 %s2340_s30, 4  ;;  %p2177_p0 = scmp.ne.s32.totalorder %s2548_s1, %s2176_s13  ;;  %s35_s10 = int_to_ptr.vmem [resolvable:$true] %s34_s10 }
   0x6   :  { %p2180_p1 = scmp.lt.u32.totalorder %s2176_s13, %s2548_s1 }
   0x8   :  { %p2182_p2 = pnand %p2180_p1, %p2177_p0 }
   0xa   :  { %2185 = shalt.err (!%p2182_p2)
}
   0xb   :  { %s2186_s18 = scalar_lea.vmem %s35_s10, 2048  ;;  %p2191_p4 = scmp.lt.s32.totalorder %s35_s10, %s35_s10 }
   0xc   :  { %p2187_p3 = scmp.ne.s32.totalorder %s35_s10, %s2186_s18  ;;  %p2192_p5 = scmp.lt.s32.totalorder %s2186_s18, %s2186_s18 }
   0xe   :  { %p2193_p6 = por %p2192_p5, %p2191_p4 }
  0x10   :  { %p2194_p7 = pnand %p2193_p6, %p2187_p3 }
  0x12   :  { %2197 = shalt.err (!%p2194_p7)
}
  0x13   :  { %s2341_s19 = smov 512   ;;  %s2342_s20 = smov 32  }
  0x14   :  { %40 = dma.hbm_to_vmem [thread:$0]  %s2548_s1, 2048, %s35_s10, [#allocation6], %s2341_s19, %s2341_s19, %s2342_s20  }
  0x15   :  { %s2343_s23 = smov [#allocation8]   ;;  %s2198_s27 = scalar_lea.hbm %s2550_s3, 16384 }
  0x16   :  { %s56_s24 = sshll.u32 %s2343_s23, 4  ;;  %p2199_p8 = scmp.ne.s32.totalorder %s2550_s3, %s2198_s27  ;;  %s57_s24 = int_to_ptr.vmem [resolvable:$true] %s56_s24 }
  0x17   :  { %p2202_p9 = scmp.lt.u32.totalorder %s2198_s27, %s2550_s3 }
  0x19   :  { %p2204_p10 = pnand %p2202_p9, %p2199_p8 }
  0x1b   :  { %2207 = shalt.err (!%p2204_p10)
}
  0x1c   :  { %s2208_s12 = scalar_lea.vmem %s57_s24, 16384  ;;  %p2213_p12 = scmp.lt.s32.totalorder %s57_s24, %s57_s24 }
  0x1d   :  { %p2209_p11 = scmp.ne.s32.totalorder %s57_s24, %s2208_s12  ;;  %p2214_p13 = scmp.lt.s32.totalorder %s2208_s12, %s2208_s12 }
  0x1f   :  { %p2215_p0 = por %p2214_p13, %p2213_p12 }
  0x21   :  { %p2216_p1 = pnand %p2215_p0, %p2209_p11 }
  0x23   :  { %2219 = shalt.err (!%p2216_p1)
}
  0x24   :  { %s2344_s1 = smov 128   ;;  %s2345_s10 = smov 8  }
  0x25   :  { %62 = dma.hbm_to_vmem [thread:$0]  %s2550_s3, 16384, %s57_s24, [#allocation9], %s2344_s1, %s2344_s1, %s2345_s10  }
  0x26   :  { %s2346_s15 = smov [#allocation2]   ;;  %s2347_s17 = smov [#allocation7]  }
  0x27   :  { %s25_s16 = sshll.u32 %s2346_s15, 4  ;;  %s47_s18 = sshll.u32 %s2347_s17, 4  ;;  %s26_s16 = int_to_ptr.vmem [resolvable:$true] %s25_s16  ;;  %s48_s18 = int_to_ptr.vmem [resolvable:$true] %s47_s18 }
  0x28   :  { %s2220_s21 = scalar_lea.hbm %s2547_s0, 64 }
  0x29   :  { %p2221_p2 = scmp.ne.s32.totalorder %s2547_s0, %s2220_s21  ;;  %p2224_p3 = scmp.lt.u32.totalorder %s2220_s21, %s2547_s0 }
  0x2b   :  { %p2226_p4 = pnand %p2224_p3, %p2221_p2 }
  0x2d   :  { %2229 = shalt.err (!%p2226_p4)
}
  0x2e   :  { %s2230_s3 = scalar_lea.vmem %s26_s16, 64  ;;  %p2235_p6 = scmp.lt.s32.totalorder %s26_s16, %s26_s16 }
  0x2f   :  { %p2231_p5 = scmp.ne.s32.totalorder %s26_s16, %s2230_s3  ;;  %p2236_p7 = scmp.lt.s32.totalorder %s2230_s3, %s2230_s3 }
  0x31   :  { %p2237_p8 = por %p2236_p7, %p2235_p6 }
  0x33   :  { %p2238_p9 = pnand %p2237_p8, %p2231_p5 }
  0x35   :  { %2241 = shalt.err (!%p2238_p9)
}
  0x36   :  { %28 = dma.hbm_to_vmem [thread:$0]  %s2547_s0, 64, %s26_s16, [#allocation3]  }
  0x37   :  { %s2242_s30 = scalar_lea.hbm %s2549_s2, 128 }
  0x38   :  { %p2243_p10 = scmp.ne.s32.totalorder %s2549_s2, %s2242_s30  ;;  %p2246_p11 = scmp.lt.u32.totalorder %s2242_s30, %s2549_s2 }
  0x3a   :  { %p2248_p12 = pnand %p2246_p11, %p2243_p10 }
  0x3c   :  { %2251 = shalt.err (!%p2248_p12)
}
  0x3d   :  { %s2252_s13 = scalar_lea.vmem %s48_s18, 128  ;;  %p2257_p0 = scmp.lt.s32.totalorder %s48_s18, %s48_s18 }
  0x3e   :  { %p2253_p13 = scmp.ne.s32.totalorder %s48_s18, %s2252_s13  ;;  %p2258_p1 = scmp.lt.s32.totalorder %s2252_s13, %s2252_s13 }
  0x40   :  { %p2259_p2 = por %p2258_p1, %p2257_p0 }
  0x42   :  { %p2260_p3 = pnand %p2259_p2, %p2253_p13 }
  0x44   :  { %2263 = shalt.err (!%p2260_p3)
}
  0x45   :  { %50 = dma.hbm_to_vmem [thread:$0]  %s2549_s2, 128, %s48_s18, [#allocation6]  }
  0x46   :  { %s2348_s15 = smov [#allocation10]   ;;  %s2264_s20 = scalar_lea.hbm %s2552_s5, 2048 }
  0x47   :  { %s70_s16 = sshll.u32 %s2348_s15, 4  ;;  %p2265_p4 = scmp.ne.s32.totalorder %s2552_s5, %s2264_s20  ;;  %s71_s16 = int_to_ptr.vmem [resolvable:$true] %s70_s16 }
  0x48   :  { %p2268_p5 = scmp.lt.u32.totalorder %s2264_s20, %s2552_s5 }
  0x4a   :  { %p2270_p6 = pnand %p2268_p5, %p2265_p4 }
  0x4c   :  { %2273 = shalt.err (!%p2270_p6)
}
  0x4d   :  { %s2274_s26 = scalar_lea.vmem %s71_s16, 2048  ;;  %p2279_p8 = scmp.lt.s32.totalorder %s71_s16, %s71_s16 }
  0x4e   :  { %p2275_p7 = scmp.ne.s32.totalorder %s71_s16, %s2274_s26  ;;  %p2280_p9 = scmp.lt.s32.totalorder %s2274_s26, %s2274_s26 }
  0x50   :  { %p2281_p10 = por %p2280_p9, %p2279_p8 }
  0x52   :  { %p2282_p11 = pnand %p2281_p10, %p2275_p7 }
  0x54   :  { %2285 = shalt.err (!%p2282_p11)
}
  0x55   :  { %s2349_s2 = smov 64   ;;  %s2350_s18 = smov 4  }
  0x56   :  { %76 = dma.hbm_to_vmem [thread:$0]  %s2552_s5, 2048, %s71_s16, [#allocation9], %s2349_s2, %s2349_s2, %s2350_s18  }
  0x57   :  { %s2351_s27 = smov [#allocation11]   ;;  %s2286_s11 = scalar_lea.hbm %s2554_s7, 1024 }
  0x58   :  { %s84_s28 = sshll.u32 %s2351_s27, 4  ;;  %p2287_p12 = scmp.ne.s32.totalorder %s2554_s7, %s2286_s11  ;;  %s85_s28 = int_to_ptr.vmem [resolvable:$true] %s84_s28 }
  0x59   :  { %p2290_p13 = scmp.lt.u32.totalorder %s2286_s11, %s2554_s7 }
  0x5b   :  { %p2292_p0 = pnand %p2290_p13, %p2287_p12 }
  0x5d   :  { %2295 = shalt.err (!%p2292_p0)
}
  0x5e   :  { %s2296_s0 = scalar_lea.vmem %s85_s28, 1024  ;;  %p2301_p2 = scmp.lt.s32.totalorder %s85_s28, %s85_s28 }
  0x5f   :  { %p2297_p1 = scmp.ne.s32.totalorder %s85_s28, %s2296_s0  ;;  %p2302_p3 = scmp.lt.s32.totalorder %s2296_s0, %s2296_s0 }
  0x61   :  { %p2303_p4 = por %p2302_p3, %p2301_p2 }
  0x63   :  { %p2304_p5 = pnand %p2303_p4, %p2297_p1 }
  0x65   :  { %2307 = shalt.err (!%p2304_p5)
}
  0x66   :  { %90 = dma.hbm_to_vmem [thread:$0]  %s2554_s7, 1024, %s85_s28, [#allocation12], %s2349_s2, %s2349_s2, %s2350_s18  }
  0x67   :  { %2330 = dma.done.wait [#allocation3], 64  }
  0x68   :  { %2331 = vsyncadd [#allocation3], 4294967232 }
  0x69   :  { %2332 = dma.done.wait [#allocation6], 2176  }
  0x6a   :  { %2333 = vsyncadd [#allocation6], 4294965120 }
  0x6b   :  { %2334 = dma.done.wait [#allocation9], 18432  }
  0x6c   :  { %2335 = vsyncadd [#allocation9], 4294948864 }
  0x6d   :  { %2336 = dma.done.wait [#allocation12], 1024  }
  0x6e   :  { %2337 = vsyncadd [#allocation12], 4294966272  ;;  %v2352_v0 = vmov 0   ;;  %v113_v1 = vld [vmem:[#allocation5] sm:$0xff]  ;;  %v114_v8 = vld [vmem:[#allocation5 + $0x8] sm:$0xff]  ;;  %vm251_vm0 = vcmask 261120  }
  0x6f   :  { %287 = vmatprep.mubr.bf16.mxu1 %v2352_v0  ;;  %v117_v2 = vld [vmem:[#allocation5 + $0x20] sm:$0xff]  ;;  %v118_v9 = vld [vmem:[#allocation5 + $0x28] sm:$0xff]  ;;  %v2479_v14 = vld [vmem:[#allocation2] sm:$0xf]  ;;  %vm2354_vm1 = vmmov 0  }
  0x70   :  { %v121_v3 = vld [vmem:[#allocation5 + $0x40] sm:$0xff]  ;;  %v1704_v4 = vcombine.high %v113_v1, %v117_v2  ;;  %v1703_v5 = vcombine.low %v113_v1, %v117_v2  ;;  %v1706_v11 = vcombine.high %v114_v8, %v118_v9  ;;  %v122_v12 = vld [vmem:[#allocation5 + $0x48] sm:$0xff]  ;;  %v1705_v15 = vcombine.low %v114_v8, %v118_v9  ;;  %v115_v18 = vld [vmem:[#allocation5 + $0x10] sm:$0xff] }
  0x71   :  { %v125_v6 = vld [vmem:[#allocation5 + $0x60] sm:$0xff]  ;;  %v126_v13 = vld [vmem:[#allocation5 + $0x68] sm:$0xff]  ;;  %v119_v19 = vld [vmem:[#allocation5 + $0x30] sm:$0xff] }
  0x72   :  { %v1712_v7 = vcombine.high %v121_v3, %v125_v6  ;;  %255 = vmatprep.subr.bf16.mxu1 %v1704_v4  ;;  %v1711_v10 = vcombine.low %v121_v3, %v125_v6  ;;  %v1714_v16 = vcombine.high %v122_v12, %v126_v13  ;;  %v1962_v17 = vld [vmem:[#allocation8 + $0x104] ss:$8 sps:$4 sm:$0xff]   ;;  %v1967_v20 = vld [vmem:[#allocation8 + $0x100] ss:$8 sps:$4 sm:$0xff]   ;;  %v1968_v21 = vld [vmem:[#allocation8 + $0x114] ss:$8 sps:$4 sm:$0xff]   ;;  %v1713_v22 = vcombine.low %v122_v12, %v126_v13 }
  0x73   :  { %256 = vmatpush1.bf16.msra.mxu1 %v1703_v5  ;;  %1256 = vmatprep.subr.bf16.mxu0 %v1962_v17  ;;  %v123_v23 = vld [vmem:[#allocation5 + $0x50] sm:$0xff]  ;;  %v1708_v24 = vcombine.high %v115_v18, %v119_v19  ;;  %v1973_v26 = vld [vmem:[#allocation8 + $0x110] ss:$8 sps:$4 sm:$0xff]   ;;  %v1707_v28 = vcombine.low %v115_v18, %v119_v19  ;;  %v1980_v33 = vld [vmem:[#allocation8 + $0x134] ss:$8 sps:$4 sm:$0xff]  }
  0x74   :  { %257 = vmatprep.subr.bf16.mxu1 %v1712_v7  ;;  %v127_v25 = vld [vmem:[#allocation5 + $0x70] sm:$0xff]  ;;  %1257 = vmatpush1.bf16.msra.mxu0 %v1967_v20  ;;  %v116_v31 = vld [vmem:[#allocation5 + $0x18] sm:$0xff] }
  0x75   :  { %1258 = vmatprep.subr.bf16.mxu0 %v1968_v21  ;;  %v1974_v27 = vld [vmem:[#allocation8 + $0x124] ss:$8 sps:$4 sm:$0xff]   ;;  %v1716_v29 = vcombine.high %v123_v23, %v127_v25  ;;  %v1979_v30 = vld [vmem:[#allocation8 + $0x120] ss:$8 sps:$4 sm:$0xff]   ;;  %v120_v32 = vld [vmem:[#allocation5 + $0x38] sm:$0xff]  ;;  %v1715_v34 = vcombine.low %v123_v23, %v127_v25 }
  0x76   :  { %v124_v35 = vld [vmem:[#allocation5 + $0x58] sm:$0xff]  ;;  %v1710_v36 = vcombine.high %v116_v31, %v120_v32  ;;  %v1986_v39 = vld [vmem:[#allocation8 + $0x144] ss:$8 sps:$4 sm:$0xff]   ;;  %v1709_v40 = vcombine.low %v116_v31, %v120_v32  ;;  %v1991_v42 = vld [vmem:[#allocation8 + $0x140] ss:$8 sps:$4 sm:$0xff]  }
  0x77   :  { %258 = vmatpush1.bf16.msra.mxu1 %v1711_v10  ;;  %v128_v37 = vld [vmem:[#allocation5 + $0x78] sm:$0xff]  ;;  %v1958_v45 = vld [vmem:[#allocation8 + $0x4] ss:$8 sps:$4 sm:$0xff]   ;;  %v1956_v48 = vld [vmem:[#allocation8] ss:$8 sps:$4 sm:$0xff]  }
  0x78   :  { %296 = vmatprep.subr.bf16.mxu1 %v1706_v11  ;;  %1259 = vmatpush1.bf16.msra.mxu0 %v1973_v26  ;;  %v1985_v38 = vld [vmem:[#allocation8 + $0x130] ss:$8 sps:$4 sm:$0xff]   ;;  %v1718_v41 = vcombine.high %v124_v35, %v128_v37  ;;  %v1992_v43 = vld [vmem:[#allocation8 + $0x154] ss:$8 sps:$4 sm:$0xff]   ;;  %v1717_v44 = vcombine.low %v124_v35, %v128_v37  ;;  %v1998_v47 = vld [vmem:[#allocation8 + $0x164] ss:$8 sps:$4 sm:$0xff]   ;;  %v131_v35 = vlaneseq }
  0x79   :  { %1260 = vmatprep.subr.bf16.mxu0 %v1974_v27  ;;  %v1997_v46 = vld [vmem:[#allocation8 + $0x150] ss:$8 sps:$4 sm:$0xff]   ;;  %v1961_v49 = vld [vmem:[#allocation8 + $0x14] ss:$8 sps:$4 sm:$0xff]   ;;  %v2003_v50 = vld [vmem:[#allocation8 + $0x160] ss:$8 sps:$4 sm:$0xff]  }
  0x7a   :  { %1719 = vmatmul.mubr.msk.bf16.vlgmr.msra.gmra.mrb[0].mxu1 %vm251_vm0, %v2479_v14  ;;  %v2004_v51 = vld [vmem:[#allocation8 + $0x174] ss:$8 sps:$4 sm:$0xff]   ;;  %v1959_v52 = vld [vmem:[#allocation8 + $0x10] ss:$8 sps:$4 sm:$0xff]   ;;  %v1966_v53 = vld [vmem:[#allocation8 + $0x24] ss:$8 sps:$4 sm:$0xff]  }
  0x7b   :  { %297 = vmatpush1.bf16.msra.mxu1 %v1705_v15  ;;  %328 = vmatprep.mubr.bf16.mxu1 %v2352_v0  ;;  %v2009_v54 = vld [vmem:[#allocation8 + $0x170] ss:$8 sps:$4 sm:$0xff]   ;;  %v2010_v55 = vld [vmem:[#allocation8 + $0x184] ss:$8 sps:$4 sm:$0xff]   ;;  %v1964_v56 = vld [vmem:[#allocation8 + $0x20] ss:$8 sps:$4 sm:$0xff]  }
  0x7c   :  { %298 = vmatprep.subr.bf16.mxu1 %v1714_v16  ;;  %1261 = vmatpush1.bf16.msra.mxu0 %v1979_v30  ;;  %v1972_v57 = vld [vmem:[#allocation8 + $0x34] ss:$8 sps:$4 sm:$0xff]   ;;  %v2015_v58 = vld [vmem:[#allocation8 + $0x180] ss:$8 sps:$4 sm:$0xff]   ;;  %v1970_v60 = vld [vmem:[#allocation8 + $0x30] ss:$8 sps:$4 sm:$0xff]  }
  0x7d   :  { %1262 = vmatprep.subr.bf16.mxu0 %v1980_v33  ;;  %v2016_v59 = vld [vmem:[#allocation8 + $0x194] ss:$8 sps:$4 sm:$0xff]   ;;  %v1978_v61 = vld [vmem:[#allocation8 + $0x44] ss:$8 sps:$4 sm:$0xff]   ;;  %v2021_v62 = vld [vmem:[#allocation8 + $0x190] ss:$8 sps:$4 sm:$0xff]  }
  0x7e   :  { %v2022_v63 = vld [vmem:[#allocation8 + $0x1a4] ss:$8 sps:$4 sm:$0xff]   ;;  %v1984_v1 = vld [vmem:[#allocation8 + $0x54] ss:$8 sps:$4 sm:$0xff]   ;;  %v2027_v2 = vld [vmem:[#allocation8 + $0x1a0] ss:$8 sps:$4 sm:$0xff]  }
  0x7f   :  { %299 = vmatpush1.bf16.msra.mxu1 %v1713_v22  ;;  %v2028_v3 = vld [vmem:[#allocation8 + $0x1b4] ss:$8 sps:$4 sm:$0xff]   ;;  %v1982_v4 = vld [vmem:[#allocation8 + $0x50] ss:$8 sps:$4 sm:$0xff]   ;;  %v1990_v5 = vld [vmem:[#allocation8 + $0x64] ss:$8 sps:$4 sm:$0xff]  }
  0x80   :  { %337 = vmatprep.subr.bf16.mxu1 %v1708_v24  ;;  %1263 = vmatpush1.bf16.msra.mxu0 %v1985_v38  ;;  %v2033_v6 = vld [vmem:[#allocation8 + $0x1b0] ss:$8 sps:$4 sm:$0xff]   ;;  %v1988_v7 = vld [vmem:[#allocation8 + $0x60] ss:$8 sps:$4 sm:$0xff]   ;;  %v1996_v8 = vld [vmem:[#allocation8 + $0x74] ss:$8 sps:$4 sm:$0xff]  }
  0x81   :  { %1264 = vmatprep.subr.bf16.mxu0 %v1986_v39  ;;  %v1994_v9 = vld [vmem:[#allocation8 + $0x70] ss:$8 sps:$4 sm:$0xff]   ;;  %v2002_v10 = vld [vmem:[#allocation8 + $0x84] ss:$8 sps:$4 sm:$0xff]   ;;  %v2000_v11 = vld [vmem:[#allocation8 + $0x80] ss:$8 sps:$4 sm:$0xff]  }
  0x82   :  { %1720 = vmatmul.mubr.msk.bf16.vlgmr.msra.gmra.mrb[4].mxu1 %vm251_vm0, %v2479_v14  ;;  %v2008_v12 = vld [vmem:[#allocation8 + $0x94] ss:$8 sps:$4 sm:$0xff]   ;;  %v2006_v13 = vld [vmem:[#allocation8 + $0x90] ss:$8 sps:$4 sm:$0xff]   ;;  %v2012_v15 = vld [vmem:[#allocation8 + $0xa0] ss:$8 sps:$4 sm:$0xff]  }
  0x83   :  { %338 = vmatpush1.bf16.msra.mxu1 %v1707_v28  ;;  %369 = vmatprep.mubr.bf16.mxu1 %v2352_v0  ;;  %v2020_v16 = vld [vmem:[#allocation8 + $0xb4] ss:$8 sps:$4 sm:$0xff]   ;;  %v2018_v17 = vld [vmem:[#allocation8 + $0xb0] ss:$8 sps:$4 sm:$0xff]   ;;  %v2026_v18 = vld [vmem:[#allocation8 + $0xc4] ss:$8 sps:$4 sm:$0xff]  }
  0x84   :  { %339 = vmatprep.subr.bf16.mxu1 %v1716_v29  ;;  %1265 = vmatpush1.bf16.msra.mxu0 %v1991_v42  ;;  %v2024_v19 = vld [vmem:[#allocation8 + $0xc0] ss:$8 sps:$4 sm:$0xff]   ;;  %v2032_v20 = vld [vmem:[#allocation8 + $0xd4] ss:$8 sps:$4 sm:$0xff]   ;;  %v2030_v21 = vld [vmem:[#allocation8 + $0xd0] ss:$8 sps:$4 sm:$0xff]  }
  0x85   :  { %1266 = vmatprep.subr.bf16.mxu0 %v1992_v43  ;;  %v2034_v22 = vld [vmem:[#allocation8 + $0x1c4] ss:$8 sps:$4 sm:$0xff]   ;;  %v2039_v24 = vld [vmem:[#allocation8 + $0x1c0] ss:$8 sps:$4 sm:$0xff]   ;;  %v2040_v26 = vld [vmem:[#allocation8 + $0x1d4] ss:$8 sps:$4 sm:$0xff]  }
  0x86   :  { %v2038_v23 = vld [vmem:[#allocation8 + $0xe4] ss:$8 sps:$4 sm:$0xff]   ;;  %v2036_v25 = vld [vmem:[#allocation8 + $0xe0] ss:$8 sps:$4 sm:$0xff]   ;;  %v2044_v27 = vld [vmem:[#allocation8 + $0xf4] ss:$8 sps:$4 sm:$0xff]  }
  0x87   :  { %340 = vmatpush1.bf16.msra.mxu1 %v1715_v34  ;;  %v2045_v28 = vld [vmem:[#allocation8 + $0x1d0] ss:$8 sps:$4 sm:$0xff]   ;;  %v2046_v30 = vld [vmem:[#allocation8 + $0x1e4] ss:$8 sps:$4 sm:$0xff]   ;;  %v2048_v31 = vld [vmem:[#allocation8 + $0x1e0] ss:$8 sps:$4 sm:$0xff]  }
  0x88   :  { %378 = vmatprep.subr.bf16.mxu1 %v1710_v36  ;;  %1267 = vmatpush1.bf16.msra.mxu0 %v1997_v46  ;;  %v2042_v29 = vld [vmem:[#allocation8 + $0xf0] ss:$8 sps:$4 sm:$0xff]   ;;  %v2049_v32 = vld [vmem:[#allocation8 + $0x1f4] ss:$8 sps:$4 sm:$0xff]   ;;  %v2054_v34 = vld [vmem:[#allocation8 + $0x204] ss:$8 sps:$4 sm:$0xff]  }
  0x89   :  { %1268 = vmatprep.subr.bf16.mxu0 %v1998_v47  ;;  %v2051_v33 = vld [vmem:[#allocation8 + $0x1f0] ss:$8 sps:$4 sm:$0xff]   ;;  %v2492_v36 = vshrl.u32 %v131_v35, 7  ;;  %v2082_v35 = vld [vmem:[#allocation8 + $0x2a0] ss:$8 sps:$4 sm:$0xff]  }
  0x8a   :  { %1721 = vmatmul.mubr.msk.bf16.vlgmr.msra.gmra.mrb[8].mxu1 %vm251_vm0, %v2479_v14  ;;  %v2495_v38 = vld [vmem:[#allocation7] sm:$0xff] }
  0x8b   :  { %379 = vmatpush1.bf16.msra.mxu1 %v1709_v40  ;;  %410 = vmatprep.mubr.bf16.mxu1 %v2352_v0  ;;  %v1976_v0 = vld [vmem:[#allocation8 + $0x40] ss:$8 sps:$4 sm:$0xff]   ;;  %v133_v37 = vsub.s32 0, %v2492_v36  ;;  %v137_v39 = vsub.s32 1, %v2492_v36 }
  0x8c   :  { %380 = vmatprep.subr.bf16.mxu1 %v1718_v41  ;;  %1269 = vmatpush1.bf16.msra.mxu0 %v2003_v50 }
  0x8d   :  { %1270 = vmatprep.subr.bf16.mxu0 %v2004_v51  ;;  %v134_v40 = vrot.slane %v2495_v38, %v133_v37  ;;  %v138_v41 = vrot.slane %v2495_v38, %v137_v39 }
  0x8f   :  { %381 = vmatpush1.bf16.msra.mxu1 %v1717_v44 }
  0x90   :  { %1215 = vmatprep.subr.bf16.mxu1 %v1958_v45  ;;  %1271 = vmatpush1.bf16.msra.mxu0 %v2009_v54  ;;  %v141_v45 = vsub.s32 2, %v2492_v36 }
  0x91   :  { %1272 = vmatprep.subr.bf16.mxu0 %v2010_v55 }
  0x92   :  { %1722 = vmatmul.mubr.msk.bf16.vlgmr.msra.gmra.mrb[12].mxu1 %vm251_vm0, %v2479_v14  ;;  %v2014_v14 = vld [vmem:[#allocation8 + $0xa4] ss:$8 sps:$4 sm:$0xff]  }
  0x93   :  { %1216 = vmatpush1.bf16.msra.mxu1 %v1956_v48  ;;  %v145_v48 = vsub.s32 3, %v2492_v36 }
  0x94   :  { %1217 = vmatprep.subr.bf16.mxu1 %v1961_v49  ;;  %1273 = vmatpush1.bf16.msra.mxu0 %v2015_v58 }
  0x95   :  { %1274 = vmatprep.subr.bf16.mxu0 %v2016_v59  ;;  %v146_v54 = vrot.slane %v2495_v38, %v145_v48  ;;  %v2091_v48 = vld [vmem:[#allocation8 + $0x2d0] ss:$8 sps:$4 sm:$0xff]  }
  0x97   :  { %1218 = vmatpush1.bf16.msra.mxu1 %v1959_v52  ;;  %v142_v52 = vrot.slane %v2495_v38, %v141_v45  ;;  %v161_v45 = vsub.s32 7, %v2492_v36 }
  0x98   :  { %1219 = vmatprep.subr.bf16.mxu1 %v1966_v53  ;;  %1275 = vmatpush1.bf16.msra.mxu0 %v2021_v62 }
  0x99   :  { %1276 = vmatprep.subr.bf16.mxu0 %v2022_v63 }
  0x9b   :  { %1220 = vmatpush1.bf16.msra.mxu1 %v1964_v56 }
  0x9c   :  { %1221 = vmatprep.subr.bf16.mxu1 %v1972_v57  ;;  %1277 = vmatpush1.bf16.msra.mxu0 %v2027_v2  ;;  %v2052_v2 = vld [vmem:[#allocation8 + $0x200] ss:$8 sps:$4 sm:$0xff]  }
  0x9d   :  { %1278 = vmatprep.subr.bf16.mxu0 %v2028_v3 }
  0x9f   :  { %1222 = vmatpush1.bf16.msra.mxu1 %v1970_v60 }
  0xa0   :  { %1223 = vmatprep.subr.bf16.mxu1 %v1978_v61  ;;  %1279 = vmatpush1.bf16.msra.mxu0 %v2033_v6  ;;  %v153_v61 = vsub.s32 5, %v2492_v36 }
  0xa1   :  { %1280 = vmatprep.subr.bf16.mxu0 %v2034_v22 }
  0xa2   :  { %v154_v3 = vrot.slane %v2495_v38, %v153_v61 }
  0xa3   :  { %1224 = vmatpush1.bf16.msra.mxu1 %v1976_v0 }
  0xa4   :  { %1225 = vmatprep.subr.bf16.mxu1 %v1984_v1  ;;  %1281 = vmatpush1.bf16.msra.mxu0 %v2039_v24  ;;  %v2069_v24 = vld [vmem:[#allocation8 + $0x254] ss:$8 sps:$4 sm:$0xff]  }
  0xa5   :  { %1282 = vmatprep.subr.bf16.mxu0 %v2040_v26  ;;  %v2072_v26 = vld [vmem:[#allocation8 + $0x264] ss:$8 sps:$4 sm:$0xff]  }
  0xa7   :  { %1226 = vmatpush1.bf16.msra.mxu1 %v1982_v4 }
  0xa8   :  { %1227 = vmatprep.subr.bf16.mxu1 %v1990_v5  ;;  %1283 = vmatpush1.bf16.msra.mxu0 %v2045_v28  ;;  %v2057_v5 = vld [vmem:[#allocation8 + $0x214] ss:$8 sps:$4 sm:$0xff]  }
  0xa9   :  { %1284 = vmatprep.subr.bf16.mxu0 %v2046_v30  ;;  %v2075_v28 = vld [vmem:[#allocation8 + $0x274] ss:$8 sps:$4 sm:$0xff]   ;;  %v2078_v30 = vld [vmem:[#allocation8 + $0x284] ss:$8 sps:$4 sm:$0xff]  }
  0xab   :  { %1228 = vmatpush1.bf16.msra.mxu1 %v1988_v7 }
  0xac   :  { %1229 = vmatprep.subr.bf16.mxu1 %v1996_v8  ;;  %1285 = vmatpush1.bf16.msra.mxu0 %v2048_v31  ;;  %v2055_v8 = vld [vmem:[#allocation8 + $0x210] ss:$8 sps:$4 sm:$0xff]   ;;  %v2076_v31 = vld [vmem:[#allocation8 + $0x280] ss:$8 sps:$4 sm:$0xff]  }
  0xad   :  { %1286 = vmatprep.subr.bf16.mxu0 %v2049_v32  ;;  %v2081_v32 = vld [vmem:[#allocation8 + $0x294] ss:$8 sps:$4 sm:$0xff]  }
  0xaf   :  { %1230 = vmatpush1.bf16.msra.mxu1 %v1994_v9 }
  0xb0   :  { %1231 = vmatprep.subr.bf16.mxu1 %v2002_v10  ;;  %1287 = vmatpush1.bf16.msra.mxu0 %v2051_v33  ;;  %v2079_v33 = vld [vmem:[#allocation8 + $0x290] ss:$8 sps:$4 sm:$0xff]  }
  0xb1   :  { %1297 = vmatprep.subr.bf16.mxu0 %v2054_v34  ;;  %v2084_v34 = vld [vmem:[#allocation8 + $0x2a4] ss:$8 sps:$4 sm:$0xff]  }
  0xb3   :  { %1232 = vmatpush1.bf16.msra.mxu1 %v2000_v11  ;;  %v2060_v11 = vld [vmem:[#allocation8 + $0x224] ss:$8 sps:$4 sm:$0xff]  }
  0xb4   :  { %1233 = vmatprep.subr.bf16.mxu1 %v2008_v12 }
  0xb7   :  { %1234 = vmatpush1.bf16.msra.mxu1 %v2006_v13 }
  0xb8   :  { %1235 = vmatprep.subr.bf16.mxu1 %v2014_v14  ;;  %v2058_v14 = vld [vmem:[#allocation8 + $0x220] ss:$8 sps:$4 sm:$0xff]  }
  0xbb   :  { %1236 = vmatpush1.bf16.msra.mxu1 %v2012_v15 }
  0xbc   :  { %1237 = vmatprep.subr.bf16.mxu1 %v2020_v16  ;;  %v2063_v16 = vld [vmem:[#allocation8 + $0x234] ss:$8 sps:$4 sm:$0xff]  }
  0xbf   :  { %1238 = vmatpush1.bf16.msra.mxu1 %v2018_v17 }
  0xc0   :  { %1239 = vmatprep.subr.bf16.mxu1 %v2026_v18 }
  0xc3   :  { %1240 = vmatpush1.bf16.msra.mxu1 %v2024_v19  ;;  %v2061_v19 = vld [vmem:[#allocation8 + $0x230] ss:$8 sps:$4 sm:$0xff]  }
  0xc4   :  { %1241 = vmatprep.subr.bf16.mxu1 %v2032_v20 }
  0xc7   :  { %1242 = vmatpush1.bf16.msra.mxu1 %v2030_v21  ;;  %v2066_v21 = vld [vmem:[#allocation8 + $0x244] ss:$8 sps:$4 sm:$0xff]  }
  0xc8   :  { %1243 = vmatprep.subr.bf16.mxu1 %v2038_v23  ;;  %v2064_v23 = vld [vmem:[#allocation8 + $0x240] ss:$8 sps:$4 sm:$0xff]  }
  0xcb   :  { %1244 = vmatpush1.bf16.msra.mxu1 %v2036_v25  ;;  %v2067_v25 = vld [vmem:[#allocation8 + $0x250] ss:$8 sps:$4 sm:$0xff]  }
  0xcc   :  { %1245 = vmatprep.subr.bf16.mxu1 %v2044_v27  ;;  %v2070_v27 = vld [vmem:[#allocation8 + $0x260] ss:$8 sps:$4 sm:$0xff]  }
  0xcf   :  { %1246 = vmatpush1.bf16.msra.mxu1 %v2042_v29  ;;  %v2073_v29 = vld [vmem:[#allocation8 + $0x270] ss:$8 sps:$4 sm:$0xff]  }
 0x14d   :  { %v289_v42 = vpop.f32.mrb[0].mxu1 }
 0x14e   :  { %v290_v43 = vadd.f32 %v289_v42, %v134_v40  ;;  %v291_v44 = vpop.f32.mrb[1].mxu1  ;;  %v2087_v40 = vld [vmem:[#allocation8 + $0x2b4] ss:$8 sps:$4 sm:$0xff]   ;;  %v2090_v42 = vld [vmem:[#allocation8 + $0x2c4] ss:$8 sps:$4 sm:$0xff]  }
 0x14f   :  { %v292_v46 = vadd.f32 %v291_v44, %v138_v41  ;;  %v293_v47 = vpop.f32.mrb[2].mxu1  ;;  %v2085_v41 = vld [vmem:[#allocation8 + $0x2b0] ss:$8 sps:$4 sm:$0xff]   ;;  %v2088_v44 = vld [vmem:[#allocation8 + $0x2c0] ss:$8 sps:$4 sm:$0xff]  }
 0x150   :  { %v419_v49 = vmax.f32 %v290_v43, 0.0  ;;  %v294_v50 = vpop.f32.mrb[3].mxu1  ;;  %v149_v43 = vsub.s32 4, %v2492_v36 }
 0x151   :  { %v420_v51 = vmax.f32 %v292_v46, 0.0  ;;  %v2093_v46 = vld [vmem:[#allocation8 + $0x2d4] ss:$8 sps:$4 sm:$0xff]   ;;  %v2096_v50 = vld [vmem:[#allocation8 + $0x2e4] ss:$8 sps:$4 sm:$0xff]  }
 0x152   :  { %v427_v55 = vpack.c.bf16 %v419_v49, %v419_v49  ;;  %v150_v47 = vrot.slane %v2495_v38, %v149_v43  ;;  %v162_v49 = vrot.slane %v2495_v38, %v161_v45  ;;  %v2144_v43 = vld [vmem:[#allocation8 + $0x3e4] ss:$8 sps:$4 sm:$0xff]  }
 0x153   :  { %v428_v53 = vpack.c.bf16 %v420_v51, %v420_v51 }
 0x155   :  { %v330_v56 = vpop.f32.mrb[4].mxu1  ;;  %1247 = vmatprep.mubr.bf16.mxu1 %v428_v53 }
 0x156   :  { %v331_v57 = vadd.f32 %v330_v56, %v142_v52  ;;  %v332_v58 = vpop.f32.mrb[5].mxu1  ;;  %1248 = vmatmul.mubr.bf16.vlgmr.msra.gmra.mrb[16].mxu1 %v427_v55  ;;  %v2094_v52 = vld [vmem:[#allocation8 + $0x2e0] ss:$8 sps:$4 sm:$0xff]   ;;  %v2097_v56 = vld [vmem:[#allocation8 + $0x2f0] ss:$8 sps:$4 sm:$0xff]  }
 0x157   :  { %v333_v59 = vadd.f32 %v332_v58, %v146_v54  ;;  %v334_v60 = vpop.f32.mrb[6].mxu1  ;;  %v2099_v54 = vld [vmem:[#allocation8 + $0x2f4] ss:$8 sps:$4 sm:$0xff]   ;;  %v2102_v58 = vld [vmem:[#allocation8 + $0x304] ss:$8 sps:$4 sm:$0xff]  }
 0x158   :  { %v421_v62 = vmax.f32 %v331_v57, 0.0  ;;  %v335_v63 = vpop.f32.mrb[7].mxu1  ;;  %v2100_v60 = vld [vmem:[#allocation8 + $0x300] ss:$8 sps:$4 sm:$0xff]  }
 0x159   :  { %v422_v0 = vmax.f32 %v333_v59, 0.0  ;;  %v2103_v63 = vld [vmem:[#allocation8 + $0x310] ss:$8 sps:$4 sm:$0xff]  }
 0x15a   :  { %v429_v4 = vpack.c.bf16 %v421_v62, %v421_v62  ;;  %v2105_v62 = vld [vmem:[#allocation8 + $0x314] ss:$8 sps:$4 sm:$0xff]  }
 0x15b   :  { %v430_v1 = vpack.c.bf16 %v422_v0, %v422_v0  ;;  %v2108_v0 = vld [vmem:[#allocation8 + $0x324] ss:$8 sps:$4 sm:$0xff]  }
 0x15d   :  { %1288 = vmatprep.mubr.bf16.mxu0 %v430_v1  ;;  %v2510_v6 = vpop.f32.mrb[8].mxu1  ;;  %v2106_v1 = vld [vmem:[#allocation8 + $0x320] ss:$8 sps:$4 sm:$0xff]  }
 0x15e   :  { %1289 = vmatmul.mubr.bf16.vlgmr.msra.gmra.mrb[0].mxu0 %v429_v4  ;;  %v373_v7 = vpop.f32.mrb[9].mxu1  ;;  %v372_v51 = vadd.f32 %v2510_v6, %v150_v47  ;;  %v2114_v4 = vld [vmem:[#allocation8 + $0x344] ss:$8 sps:$4 sm:$0xff]   ;;  %v2117_v6 = vld [vmem:[#allocation8 + $0x354] ss:$8 sps:$4 sm:$0xff]  }
 0x15f   :  { %1298 = vmatpush1.bf16.msra.mxu0 %v2052_v2  ;;  %v374_v9 = vadd.f32 %v373_v7, %v154_v3  ;;  %v375_v10 = vpop.f32.mrb[10].mxu1  ;;  %v2111_v2 = vld [vmem:[#allocation8 + $0x334] ss:$8 sps:$4 sm:$0xff]   ;;  %v2109_v3 = vld [vmem:[#allocation8 + $0x330] ss:$8 sps:$4 sm:$0xff]   ;;  %v2148_v7 = vld [vmem:[#allocation10 + $0x40] sm:$0xff]  }
 0x160   :  { %1299 = vmatprep.subr.bf16.mxu0 %v2057_v5  ;;  %v376_v12 = vpop.f32.mrb[11].mxu1  ;;  %v423_v55 = vmax.f32 %v372_v51, 0.0  ;;  %v2112_v5 = vld [vmem:[#allocation8 + $0x340] ss:$8 sps:$4 sm:$0xff]   ;;  %1877 = vmatprep.subr.bf16.mxu1 %v2148_v7  ;;  %v2115_v10 = vld [vmem:[#allocation8 + $0x350] ss:$8 sps:$4 sm:$0xff]  }
 0x161   :  { %v424_v13 = vmax.f32 %v374_v9, 0.0  ;;  %v2150_v9 = vld [vmem:[#allocation10 + $0x48] sm:$0xff]   ;;  %v2145_v47 = vld [vmem:[#allocation8 + $0x3f0] ss:$8 sps:$4 sm:$0xff]   ;;  %v2164_v7 = vld [vmem:[#allocation11] sm:$0xff]  }
 0x162   :  { %v431_v59 = vpack.c.bf16 %v423_v55, %v423_v55  ;;  %v2120_v12 = vld [vmem:[#allocation8 + $0x364] ss:$8 sps:$4 sm:$0xff]   ;;  %v2162_v55 = vld [vmem:[#allocation10 + $0x78] sm:$0xff]  }
 0x163   :  { %1300 = vmatpush1.bf16.msra.mxu0 %v2055_v8  ;;  %v432_v15 = vpack.c.bf16 %v424_v13, %v424_v13  ;;  %v2149_v8 = vld [vmem:[#allocation10] sm:$0xff]   ;;  %v2152_v13 = vld [vmem:[#allocation10 + $0x50] sm:$0xff]  }
 0x164   :  { %1301 = vmatprep.subr.bf16.mxu0 %v2060_v11  ;;  %1878 = vmatpush3.bf16.msra.mxu1 %v2149_v8  ;;  %v2151_v11 = vld [vmem:[#allocation10 + $0x8] sm:$0xff]  }
 0x165   :  { %1329 = vmatprep.mubr.bf16.mxu0 %v432_v15  ;;  %v2512_v17 = vpop.f32.mrb[12].mxu1  ;;  %1879 = vmatprep.subr.bf16.mxu1 %v2150_v9  ;;  %v2153_v15 = vld [vmem:[#allocation10 + $0x10] sm:$0xff]   ;;  %v2168_v9 = vld [vmem:[#allocation11 + $0x20] sm:$0xff]  }
 0x166   :  { %v414_v18 = vpop.f32.mrb[13].mxu1 }
 0x167   :  { %1302 = vmatpush1.bf16.msra.mxu0 %v2058_v14  ;;  %v416_v20 = vpop.f32.mrb[14].mxu1  ;;  %v415_v53 = vadd.f32 %v414_v18, %v162_v49  ;;  %v2118_v14 = vld [vmem:[#allocation8 + $0x360] ss:$8 sps:$4 sm:$0xff]   ;;  %v2154_v18 = vld [vmem:[#allocation10 + $0x58] sm:$0xff]  }
 0x168   :  { %1303 = vmatprep.subr.bf16.mxu0 %v2063_v16  ;;  %v417_v22 = vpop.f32.mrb[15].mxu1  ;;  %1880 = vmatpush3.bf16.msra.mxu1 %v2151_v11  ;;  %v2123_v16 = vld [vmem:[#allocation8 + $0x374] ss:$8 sps:$4 sm:$0xff]  }
 0x169   :  { %v426_v57 = vmax.f32 %v415_v53, 0.0  ;;  %1881 = vmatprep.subr.bf16.mxu1 %v2152_v13  ;;  %v2155_v20 = vld [vmem:[#allocation10 + $0x18] sm:$0xff]   ;;  %v2156_v22 = vld [vmem:[#allocation10 + $0x60] sm:$0xff]   ;;  %v2170_v11 = vld [vmem:[#allocation11 + $0x30] sm:$0xff]  }
 0x16b   :  { %1304 = vmatpush1.bf16.msra.mxu0 %v2061_v19  ;;  %v434_v61 = vpack.c.bf16 %v426_v57, %v426_v57  ;;  %v2121_v19 = vld [vmem:[#allocation8 + $0x370] ss:$8 sps:$4 sm:$0xff]   ;;  %v563_v57 = vld [vmem:[%s2551_s4] sm:$0x3] }
 0x16c   :  { %1305 = vmatprep.subr.bf16.mxu0 %v2066_v21  ;;  %1882 = vmatpush3.bf16.msra.mxu1 %v2153_v15  ;;  %v2126_v21 = vld [vmem:[#allocation8 + $0x384] ss:$8 sps:$4 sm:$0xff]  }
 0x16d   :  { %1883 = vmatprep.subr.bf16.mxu1 %v2154_v18 }
 0x16f   :  { %1306 = vmatpush1.bf16.msra.mxu0 %v2064_v23  ;;  %v2124_v23 = vld [vmem:[#allocation8 + $0x380] ss:$8 sps:$4 sm:$0xff]  }
 0x170   :  { %1307 = vmatprep.subr.bf16.mxu0 %v2069_v24  ;;  %1884 = vmatpush3.bf16.msra.mxu1 %v2155_v20  ;;  %v2157_v24 = vld [vmem:[#allocation10 + $0x20] sm:$0xff]  }
 0x171   :  { %1885 = vmatprep.subr.bf16.mxu1 %v2156_v22 }
 0x173   :  { %1308 = vmatpush1.bf16.msra.mxu0 %v2067_v25  ;;  %v2129_v25 = vld [vmem:[#allocation8 + $0x394] ss:$8 sps:$4 sm:$0xff]  }
 0x174   :  { %1309 = vmatprep.subr.bf16.mxu0 %v2072_v26  ;;  %v2158_v26 = vld [vmem:[#allocation10 + $0x68] sm:$0xff]   ;;  %1886 = vmatpush3.bf16.msra.mxu1 %v2157_v24 }
 0x175   :  { %1887 = vmatprep.subr.bf16.mxu1 %v2158_v26 }
 0x177   :  { %1310 = vmatpush1.bf16.msra.mxu0 %v2070_v27  ;;  %v2127_v27 = vld [vmem:[#allocation8 + $0x390] ss:$8 sps:$4 sm:$0xff]  }
 0x178   :  { %1311 = vmatprep.subr.bf16.mxu0 %v2075_v28  ;;  %v2159_v28 = vld [vmem:[#allocation10 + $0x28] sm:$0xff]  }
 0x179   :  { %1888 = vmatpush3.bf16.msra.mxu1 %v2159_v28 }
 0x17b   :  { %1312 = vmatpush1.bf16.msra.mxu0 %v2073_v29  ;;  %v2132_v29 = vld [vmem:[#allocation8 + $0x3a4] ss:$8 sps:$4 sm:$0xff]  }
 0x17c   :  { %1313 = vmatprep.subr.bf16.mxu0 %v2078_v30  ;;  %v2130_v30 = vld [vmem:[#allocation8 + $0x3a0] ss:$8 sps:$4 sm:$0xff]  }
 0x17f   :  { %1314 = vmatpush1.bf16.msra.mxu0 %v2076_v31  ;;  %v2135_v31 = vld [vmem:[#allocation8 + $0x3b4] ss:$8 sps:$4 sm:$0xff]  }
 0x180   :  { %1315 = vmatprep.subr.bf16.mxu0 %v2081_v32  ;;  %v2133_v32 = vld [vmem:[#allocation8 + $0x3b0] ss:$8 sps:$4 sm:$0xff]  }
 0x183   :  { %1316 = vmatpush1.bf16.msra.mxu0 %v2079_v33  ;;  %v2138_v33 = vld [vmem:[#allocation8 + $0x3c4] ss:$8 sps:$4 sm:$0xff]  }
 0x184   :  { %1317 = vmatprep.subr.bf16.mxu0 %v2084_v34  ;;  %v2136_v34 = vld [vmem:[#allocation8 + $0x3c0] ss:$8 sps:$4 sm:$0xff]  }
 0x187   :  { %1318 = vmatpush1.bf16.msra.mxu0 %v2082_v35  ;;  %v2141_v35 = vld [vmem:[#allocation8 + $0x3d4] ss:$8 sps:$4 sm:$0xff]  }
 0x188   :  { %1319 = vmatprep.subr.bf16.mxu0 %v2087_v40  ;;  %v157_v40 = vsub.s32 6, %v2492_v36  ;;  %v2166_v36 = vld [vmem:[#allocation11 + $0x10] sm:$0xff]  }
 0x18b   :  { %1320 = vmatpush1.bf16.msra.mxu0 %v2085_v41  ;;  %v2139_v41 = vld [vmem:[#allocation8 + $0x3d0] ss:$8 sps:$4 sm:$0xff]  }
 0x18c   :  { %1321 = vmatprep.subr.bf16.mxu0 %v2090_v42  ;;  %v158_v42 = vrot.slane %v2495_v38, %v157_v40  ;;  %v2161_v38 = vld [vmem:[#allocation10 + $0x30] sm:$0xff]  }
 0x18e   :  { %v413_v45 = vadd.f32 %v2512_v17, %v158_v42  ;;  %v2353_v17 = vmov 0.0  }
 0x18f   :  { %1322 = vmatpush1.bf16.msra.mxu0 %v2088_v44  ;;  %v2142_v44 = vld [vmem:[#allocation8 + $0x3e0] ss:$8 sps:$4 sm:$0xff]  }
 0x190   :  { %1323 = vmatprep.subr.bf16.mxu0 %v2093_v46  ;;  %v2147_v46 = vld [vmem:[#allocation8 + $0x3f4] ss:$8 sps:$4 sm:$0xff]  }
 0x193   :  { %1324 = vmatpush1.bf16.msra.mxu0 %v2091_v48  ;;  %v425_v48 = vmax.f32 %v413_v45, 0.0 }
 0x194   :  { %1325 = vmatprep.subr.bf16.mxu0 %v2096_v50 }
 0x195   :  { %v433_v49 = vpack.c.bf16 %v425_v48, %v425_v48 }
 0x197   :  { %1326 = vmatpush1.bf16.msra.mxu0 %v2094_v52 }
 0x198   :  { %1327 = vmatprep.subr.bf16.mxu0 %v2099_v54  ;;  %v2160_v54 = vld [vmem:[#allocation10 + $0x70] sm:$0xff]  }
 0x199   :  { %1889 = vmatprep.subr.bf16.mxu1 %v2160_v54 }
 0x19a   :  { %1890 = vmatpush3.bf16.msra.mxu1 %v2161_v38 }
 0x19b   :  { %1328 = vmatpush1.bf16.msra.mxu0 %v2097_v56  ;;  %v2163_v56 = vld [vmem:[#allocation10 + $0x38] sm:$0xff]   ;;  %1891 = vmatprep.subr.bf16.mxu1 %v2162_v55 }
 0x19c   :  { %1338 = vmatprep.subr.bf16.mxu0 %v2102_v58  ;;  %v568_v58 = vrot.slane %v563_v57, %v133_v37  ;;  %v2165_v37 = vld [vmem:[#allocation11 + $0x8] sm:$0xff]  }
 0x19e   :  { %1330 = vmatmul.mubr.bf16.vlgmr.msra.gmra.mrb[0].mxu0 %v431_v59  ;;  %1892 = vmatpush3.bf16.msra.mxu1 %v2163_v56  ;;  %v572_v59 = vrot.slane %v563_v57, %v137_v39  ;;  %v2167_v39 = vld [vmem:[#allocation11 + $0x18] sm:$0xff]  }
 0x19f   :  { %1339 = vmatpush1.bf16.msra.mxu0 %v2100_v60  ;;  %1370 = vmatprep.mubr.bf16.mxu0 %v434_v61 }
 0x1a0   :  { %1340 = vmatprep.subr.bf16.mxu0 %v2105_v62  ;;  %1908 = vmatprep.subr.bf16.mxu1 %v2353_v17 }
 0x1a3   :  { %1341 = vmatpush1.bf16.msra.mxu0 %v2103_v63 }
 0x1a4   :  { %1342 = vmatprep.subr.bf16.mxu0 %v2108_v0 }
 0x1a7   :  { %1343 = vmatpush1.bf16.msra.mxu0 %v2106_v1 }
 0x1a8   :  { %1344 = vmatprep.subr.bf16.mxu0 %v2111_v2 }
 0x1ab   :  { %1345 = vmatpush1.bf16.msra.mxu0 %v2109_v3 }
 0x1ac   :  { %1346 = vmatprep.subr.bf16.mxu0 %v2114_v4 }
 0x1af   :  { %1347 = vmatpush1.bf16.msra.mxu0 %v2112_v5 }
 0x1b0   :  { %1348 = vmatprep.subr.bf16.mxu0 %v2117_v6 }
 0x1b3   :  { %1349 = vmatpush1.bf16.msra.mxu0 %v2115_v10  ;;  %v2169_v10 = vld [vmem:[#allocation11 + $0x28] sm:$0xff]  }
 0x1b4   :  { %1350 = vmatprep.subr.bf16.mxu0 %v2120_v12  ;;  %v2171_v12 = vld [vmem:[#allocation11 + $0x38] sm:$0xff]  }
 0x1b7   :  { %1351 = vmatpush1.bf16.msra.mxu0 %v2118_v14  ;;  %v1851_v14 = vld [vmem:[%s2553_s6] ss:$0 sm:$0xff]  ;;  %s2355_s6 = smov [#allocation13]  }
 0x1b8   :  { %1352 = vmatprep.subr.bf16.mxu0 %v2123_v16  ;;  %s1691_s20 = sshll.u32 %s2355_s6, 4  ;;  %s1692_s20 = int_to_ptr.vmem [resolvable:$true] %s1691_s20 }
 0x1b9   :  { %p2313_p7 = scmp.lt.s32.totalorder %s1692_s20, %s1692_s20 }
 0x1bb   :  { %1353 = vmatpush1.bf16.msra.mxu0 %v2121_v19 }
 0x1bc   :  { %1354 = vmatprep.subr.bf16.mxu0 %v2126_v21 }
 0x1bf   :  { %1355 = vmatpush1.bf16.msra.mxu0 %v2124_v23  ;;  %v1868_v23 = vld [vmem:[%s2555_s8] ss:$0 sm:$0xff]  ;;  %s2308_s8 = scalar_lea.vmem %s1692_s20, 128 }
 0x1c0   :  { %1356 = vmatprep.subr.bf16.mxu0 %v2129_v25  ;;  %p2309_p6 = scmp.ne.s32.totalorder %s1692_s20, %s2308_s8  ;;  %p2314_p8 = scmp.lt.s32.totalorder %s2308_s8, %s2308_s8 }
 0x1c2   :  { %p2315_p9 = por %p2314_p8, %p2313_p7 }
 0x1c3   :  { %1357 = vmatpush1.bf16.msra.mxu0 %v2127_v27 }
 0x1c4   :  { %1358 = vmatprep.subr.bf16.mxu0 %v2132_v29  ;;  %p2316_p10 = pnand %p2315_p9, %p2309_p6 }
 0x1c7   :  { %1359 = vmatpush1.bf16.msra.mxu0 %v2130_v30 }
 0x1c8   :  { %1360 = vmatprep.subr.bf16.mxu0 %v2135_v31 }
 0x1cb   :  { %1361 = vmatpush1.bf16.msra.mxu0 %v2133_v32 }
 0x1cc   :  { %1362 = vmatprep.subr.bf16.mxu0 %v2138_v33 }
 0x1cf   :  { %1363 = vmatpush1.bf16.msra.mxu0 %v2136_v34 }
 0x1d0   :  { %1364 = vmatprep.subr.bf16.mxu0 %v2141_v35 }
 0x1d3   :  { %1365 = vmatpush1.bf16.msra.mxu0 %v2139_v41 }
 0x1d4   :  { %1366 = vmatprep.subr.bf16.mxu0 %v2144_v43 }
 0x1d7   :  { %1367 = vmatpush1.bf16.msra.mxu0 %v2142_v44 }
 0x1d8   :  { %1368 = vmatprep.subr.bf16.mxu0 %v2147_v46 }
 0x1db   :  { %1369 = vmatpush1.bf16.msra.mxu0 %v2145_v47 }
 0x1de   :  { %1371 = vmatmul.mubr.bf16.vlgmr.msra.gmra.mrb[0].mxu0 %v433_v49 }
 0x229   :  { %v1249_v50 = vpop.f32.mrb[16].mxu1 }
 0x22a   :  { %v1251_v51 = vpop.f32.mrb[17].mxu1  ;;  %v1250_v60 = vadd.f32 %v1249_v50, %v568_v58 }
 0x22b   :  { %v1253_v52 = vpop.f32.mrb[18].mxu1  ;;  %v1252_v61 = vadd.f32 %v1251_v51, %v572_v59 }
 0x22c   :  { %v1254_v53 = vpop.f32.mrb[19].mxu1 }
 0x2b1   :  { %v1372_v62 = vpop.f32.mrb[0].mxu0 }
 0x2b2   :  { %v1929_v63 = vadd.f32 %v1372_v62, %v1250_v60  ;;  %v1374_v0 = vpop.f32.mrb[1].mxu0 }
 0x2b3   :  { %v1931_v1 = vadd.f32 %v1374_v0, %v1252_v61  ;;  %v1376_v2 = vpop.f32.mrb[2].mxu0 }
 0x2b4   :  { %v1379_v3 = vmax.f32 %v1929_v63, 0.0  ;;  %v1377_v4 = vpop.f32.mrb[3].mxu0 }
 0x2b5   :  { %v1380_v5 = vmax.f32 %v1931_v1, 0.0 }
 0x2b6   :  { %v1381_v8 = vpack.c.bf16 %v1379_v3, %v1379_v3 }
 0x2b7   :  { %v1382_v6 = vpack.c.bf16 %v1380_v5, %v1380_v5 }
 0x2b9   :  { %1550 = vmatprep.mubr.bf16.mxu1 %v1382_v6 }
 0x2ba   :  { %1551 = vmatmul.mubr.bf16.vlgmr.msra.gmra.mrb[20].mxu1 %v1381_v8 }
 0x2bb   :  { %1909 = vmatpush3.bf16.msra.mxu1 %v2164_v7  ;;  %1924 = vmatprep.mubr.msk.bf16.mxu1 %vm2354_vm1, %v2353_v17 }
 0x2bc   :  { %1910 = vmatprep.subr.bf16.mxu1 %v2353_v17 }
 0x2bf   :  { %1911 = vmatpush3.bf16.msra.mxu1 %v2165_v37 }
 0x2c0   :  { %1912 = vmatprep.subr.bf16.mxu1 %v2353_v17 }
 0x2c3   :  { %1913 = vmatpush3.bf16.msra.mxu1 %v2166_v36 }
 0x2c4   :  { %1914 = vmatprep.subr.bf16.mxu1 %v2353_v17 }
 0x2c7   :  { %1915 = vmatpush3.bf16.msra.mxu1 %v2167_v39 }
 0x2c8   :  { %1916 = vmatprep.subr.bf16.mxu1 %v2353_v17 }
 0x2cb   :  { %1917 = vmatpush3.bf16.msra.mxu1 %v2168_v9 }
 0x2cc   :  { %1918 = vmatprep.subr.bf16.mxu1 %v2353_v17 }
 0x2cf   :  { %1919 = vmatpush3.bf16.msra.mxu1 %v2169_v10 }
 0x2d0   :  { %1920 = vmatprep.subr.bf16.mxu1 %v2353_v17 }
 0x2d3   :  { %1921 = vmatpush3.bf16.msra.mxu1 %v2170_v11 }
 0x2d4   :  { %1922 = vmatprep.subr.bf16.mxu1 %v2353_v17 }
 0x2d7   :  { %1923 = vmatpush3.bf16.msra.mxu1 %v2171_v12 }
 0x38d   :  { %v1893_v13 = vpop.f32.mrb[20].mxu1 }
 0x38e   :  { %v1894_v15 = vpop.f32.mrb[21].mxu1 }
 0x38f   :  { %v1895_v16 = vadd.f32 %v1894_v15, %v1893_v13  ;;  %v1896_v18 = vpop.f32.mrb[22].mxu1 }
 0x390   :  { %v1897_v19 = vpop.f32.mrb[23].mxu1 }
 0x391   :  { %v1553_v20 = vadd.f32 %v1895_v16, %v1851_v14 }
 0x393   :  { %v1558_v21 = vmax.f32 %v1553_v20, 0.0 }
 0x395   :  { %v1559_v22 = vpack.c.bf16 %v1558_v21, %v1558_v21 }
 0x397   :  { %1925 = vmatmul.mubr.bf16.vlgmr.msra.gmra.mrb[24].mxu1 %v1559_v22 }
 0x46a   :  { %v1665_v24 = vpop.f32.mrb[24].mxu1 }
 0x46b   :  { %v1666_v25 = vadd.f32 %v1868_v23, %v1665_v24  ;;  %v1926_v26 = vpop.f32.mrb[25].mxu1 }
 0x46c   :  { %v1668_v27 = vpop.f32.mrb[26].mxu1 }
 0x46d   :  { %v1672_v28 = vmul.f32 1.442695, %v1666_v25  ;;  %v1927_v29 = vpop.f32.mrb[27].mxu1  ;;  %vm1671_vm3 = vcmp.gt.f32.partialorder %v1666_v25, 20.0 }
 0x46f   :  { %2172 = vpow2.f32 %v1672_v28 }
 0x479   :  { %v2173_v30 = vpop.eup %2172 }
 0x47a   :  { %v1674_v31 = vadd.f32 1.0, %v2173_v30  ;;  %v1677_v32 = vmul.f32 -0.5, %v2173_v30  ;;  %v1680_v34 = vand.u32 2147483647, %v2173_v30 }
 0x47c   :  { %2174 = vlog2.f32 %v1674_v31  ;;  %v1678_v33 = vadd.f32 1.0, %v1677_v32  ;;  %vm1681_vm2 = vcmp.lt.f32.partialorder %v1680_v34, 0.0004427343 }
 0x47e   :  { %v1679_v41 = vmul.f32 %v2173_v30, %v1678_v33 }
 0x486   :  { %v2175_v35 = vpop.eup %2174 }
 0x487   :  { %v1676_v40 = vmul.f32 0.6931472, %v2175_v35 }
 0x489   :  { %v1682_v42 = vsel %vm1681_vm2, %v1679_v41, %v1676_v40 }
 0x48a   :  { %v1683_v43 = vsel %vm1671_vm3, %v1666_v25, %v1682_v42 }
 0x48b   :  { %1684 = vst [vmem:[#allocation13] sm:$0xff] %v1683_v43 }
 0x48c   :  { %2319 = shalt.err (!%p2316_p10)
}
 0x48d   :  { %s2320_s23 = scalar_lea.hbm %s2556_s9, 128 }
 0x48e   :  { %p2321_p11 = scmp.ne.s32.totalorder %s2556_s9, %s2320_s23  ;;  %p2324_p12 = scmp.lt.u32.totalorder %s2320_s23, %s2556_s9 }
 0x490   :  { %p2326_p13 = pnand %p2324_p12, %p2321_p11 }
 0x492   :  { %2329 = shalt.err (!%p2326_p13)
}
 0x493   :  { %1694 = dma.vmem_to_hbm [thread:$0]  %s1692_s20, 128, %s2556_s9, [#allocation4]  }
 0x494   :  { %2338 = dma.done.wait [#allocation4], 128  }
 0x495   :  { %2339 = vsyncadd [#allocation4], 4294967168 }
 0x496   :  { %1698 = vsyncpa [#allocation3], 1 }
 0x497   :  { %1699 = vsyncpa [#allocation6], 1 }
 0x498   :  { %1700 = vsyncpa [#allocation9], 1 }
 0x499   :  { %1701 = vsyncpa [#allocation12], 1 }
 0x49a   :  { %1702 = vsyncpa [#allocation4], 1 }

</bundles_post_ra>
